<compile_context>
chip_gen: v6e
topology: v6e:2x2x1
jax: 0.10.0
libtpu: 0.0.40
codegen_flags: <defaults>
</compile_context>

<pallas_src>
import functools
import math

import jax
import jax.numpy as jnp
from jax.experimental import pallas as pl
from jax.experimental.pallas import tpu as pltpu


# ----------------------------------------------------------------------------
# small helpers
# ----------------------------------------------------------------------------
def _round_up(x, m):
    return ((x + m - 1) // m) * m


def _pad2d(x, rows, cols):
    r, c = x.shape
    if r == rows and c == cols:
        return x
    return jnp.pad(x, ((0, rows - r), (0, cols - c)))


def _largest_divisor(total, cap, align):
    """Largest multiple of `align` that divides `total` and is <= cap.

    `total` must itself be a multiple of `align` (so `align` always works)."""
    t = max(align, (min(cap, total) // align) * align)
    while total % t:
        t -= align
    return t


# ----------------------------------------------------------------------------
# tiled dense:  (M,K) @ (K,N) + b   (bf16 in, f32 accumulate, bf16 out)
# ----------------------------------------------------------------------------
def _dense_kernel(x_ref, w_ref, b_ref, o_ref, acc_ref):
    @pl.when(pl.program_id(2) == 0)
    def _():
        acc_ref[...] = jnp.zeros_like(acc_ref)

    acc_ref[...] += jnp.dot(x_ref[...], w_ref[...],
                            preferred_element_type=jnp.float32)

    @pl.when(pl.program_id(2) == pl.num_programs(2) - 1)
    def _():
        o_ref[...] = (acc_ref[...] + b_ref[...]).astype(o_ref.dtype)


def pallas_dense(x2d, w, b, tm_cap=512, tn_cap=768, tk_cap=768):
    """Tiled & pipelined dense projection. Tiles are divisors of the aligned
    dims (no 33% padding on 768-family BERT shapes)."""
    M, K = x2d.shape
    Kw, N = w.shape
    assert K == Kw
    Mp = _round_up(M, 8)
    Kp = _round_up(K, 128)
    Np = _round_up(N, 128)
    tm = _largest_divisor(Mp, tm_cap, 8)
    tk = _largest_divisor(Kp, tk_cap, 128)
    tn = _largest_divisor(Np, tn_cap, 128)

    xp = _pad2d(x2d.astype(jnp.bfloat16), Mp, Kp)
    wp = _pad2d(w.astype(jnp.bfloat16), Kp, Np)
    bp = _pad2d(b.reshape(1, N).astype(jnp.float32), 1, Np)

    out = pl.pallas_call(
        _dense_kernel,
        out_shape=jax.ShapeDtypeStruct((Mp, Np), jnp.bfloat16),
        grid=(Mp // tm, Np // tn, Kp // tk),
        in_specs=[
            pl.BlockSpec((tm, tk), lambda i, j, k: (i, k)),
            pl.BlockSpec((tk, tn), lambda i, j, k: (k, j)),
            pl.BlockSpec((1, tn), lambda i, j, k: (0, j)),
        ],
        out_specs=pl.BlockSpec((tm, tn), lambda i, j, k: (i, j)),
        scratch_shapes=[pltpu.VMEM((tm, tn), jnp.float32)],
        compiler_params=pltpu.CompilerParams(
            dimension_semantics=("parallel", "parallel", "arbitrary"),
            vmem_limit_bytes=48 * 1024 * 1024,
        ),
    )(xp, wp, bp)
    return out[:M, :N]


# ----------------------------------------------------------------------------
# fused FFN:  gelu(x @ w1 + b1) @ w2 + b2   (no (M, FF) HBM round trip)
# ----------------------------------------------------------------------------
def _ffn_kernel(x_ref, w1_ref, b1_ref, w2_ref, b2_ref, o_ref, acc_ref):
    @pl.when(pl.program_id(1) == 0)
    def _():
        acc_ref[...] = jnp.zeros_like(acc_ref)

    g = jnp.dot(x_ref[...], w1_ref[...], preferred_element_type=jnp.float32)
    g = jax.nn.gelu(g + b1_ref[...], approximate=True)     # gelu_new variant
    acc_ref[...] += jnp.dot(g.astype(jnp.bfloat16), w2_ref[...],
                            preferred_element_type=jnp.float32)

    @pl.when(pl.program_id(1) == pl.num_programs(1) - 1)
    def _():
        o_ref[...] = (acc_ref[...] + b2_ref[...]).astype(o_ref.dtype)


def pallas_ffn(x2d, w1, b1, w2, b2, tm_cap=512, tf_cap=768):
    M, D = x2d.shape
    FF = w1.shape[1]
    N = w2.shape[1]
    Mp = _round_up(M, 8)
    FFp = _round_up(FF, 128)
    tm = _largest_divisor(Mp, tm_cap, 8)
    tf = _largest_divisor(FFp, tf_cap, 128)

    xp = _pad2d(x2d.astype(jnp.bfloat16), Mp, D)
    w1p = _pad2d(w1.astype(jnp.bfloat16), D, FFp)
    b1p = _pad2d(b1.reshape(1, FF).astype(jnp.float32), 1, FFp)
    w2p = _pad2d(w2.astype(jnp.bfloat16), FFp, N)
    b2p = b2.reshape(1, N).astype(jnp.float32)

    out = pl.pallas_call(
        _ffn_kernel,
        out_shape=jax.ShapeDtypeStruct((Mp, N), jnp.bfloat16),
        grid=(Mp // tm, FFp // tf),
        in_specs=[
            pl.BlockSpec((tm, D), lambda i, f: (i, 0)),
            pl.BlockSpec((D, tf), lambda i, f: (0, f)),
            pl.BlockSpec((1, tf), lambda i, f: (0, f)),
            pl.BlockSpec((tf, N), lambda i, f: (f, 0)),
            pl.BlockSpec((1, N), lambda i, f: (0, 0)),
        ],
        out_specs=pl.BlockSpec((tm, N), lambda i, f: (i, 0)),
        scratch_shapes=[pltpu.VMEM((tm, N), jnp.float32)],
        compiler_params=pltpu.CompilerParams(
            dimension_semantics=("parallel", "arbitrary"),
            vmem_limit_bytes=48 * 1024 * 1024,
        ),
    )(xp, w1p, b1p, w2p, b2p)
    return out[:M]


# ----------------------------------------------------------------------------
# fused residual-add + LayerNorm, tiled over rows (mem-bound: big row tiles)
# ----------------------------------------------------------------------------
def _add_ln_kernel(x_ref, r_ref, g_ref, b_ref, o_ref, *, eps):
    x = x_ref[...].astype(jnp.float32) + r_ref[...].astype(jnp.float32)
    mu = jnp.mean(x, axis=-1, keepdims=True)
    xc = x - mu
    var = jnp.mean(xc * xc, axis=-1, keepdims=True)
    y = xc * jax.lax.rsqrt(var + eps) * g_ref[...] + b_ref[...]
    o_ref[...] = y.astype(o_ref.dtype)


def pallas_add_layernorm(x2d, r2d, gamma, beta, eps=1e-12, tm_cap=1024):
    M, D = x2d.shape
    tm = _largest_divisor(_round_up(M, 8), tm_cap, 8)
    Mp = _round_up(M, tm)
    xp = _pad2d(x2d.astype(jnp.bfloat16), Mp, D)
    rp = _pad2d(r2d.astype(jnp.bfloat16), Mp, D)
    kernel = functools.partial(_add_ln_kernel, eps=eps)
    out = pl.pallas_call(
        kernel,
        out_shape=jax.ShapeDtypeStruct((Mp, D), jnp.bfloat16),
        grid=(Mp // tm,),
        in_specs=[
            pl.BlockSpec((tm, D), lambda i: (i, 0)),
            pl.BlockSpec((tm, D), lambda i: (i, 0)),
            pl.BlockSpec((1, D), lambda i: (0, 0)),
            pl.BlockSpec((1, D), lambda i: (0, 0)),
        ],
        out_specs=pl.BlockSpec((tm, D), lambda i: (i, 0)),
        compiler_params=pltpu.CompilerParams(dimension_semantics=("parallel",)),
    )(xp, rp, gamma.reshape(1, D).astype(jnp.float32),
      beta.reshape(1, D).astype(jnp.float32))
    return out[:M]


# ----------------------------------------------------------------------------
# attention: grid over (batch, head), full-Dh lane-dense blocks, one head / step
# ----------------------------------------------------------------------------
def _attention_kernel(q_ref, k_ref, v_ref, m_ref, o_ref, *, scale):
    qh = q_ref[0, 0, 0] * scale                        # (S, Dh) bf16, pre-scaled
    kh = k_ref[0, 0, 0]
    vh = v_ref[0, 0, 0]
    m = m_ref[0]                                       # (1, S) additive key mask
    s = jax.lax.dot_general(qh, kh, (((1,), (1,)), ((), ())),
                            preferred_element_type=jnp.float32)   # (S, S)
    s = s + m
    s = s - jnp.max(s, axis=-1, keepdims=True)
    p = jnp.exp(s)
    p = p * pl.reciprocal(jnp.sum(p, axis=-1, keepdims=True), approx=True)
    ctx = jnp.dot(p.astype(vh.dtype), vh, preferred_element_type=jnp.float32)
    o_ref[0, 0] = ctx.astype(o_ref.dtype)


def pallas_attention(qkv_t, mask_add):
    """qkv_t: (3, B, H, S, Dh) bf16 (q/k/v stacked, head-major).
    Returns ctx: (B, H, S, Dh) bf16."""
    _, B, H, S, Dh = qkv_t.shape
    kernel = functools.partial(_attention_kernel, scale=1.0 / math.sqrt(Dh))

    def qkv_spec(which):
        return pl.BlockSpec((1, 1, 1, S, Dh),
                            lambda b, h, w=which: (w, b, h, 0, 0))

    # TODO(synk): for long sequences (S >= ~1k) tile the query dim flash-style
    # (grid=(B, H, S//tq) with online softmax) to respect v7x's 64 MiB VMEM.
    return pl.pallas_call(
        kernel,
        out_shape=jax.ShapeDtypeStruct((B, H, S, Dh), jnp.bfloat16),
        grid=(B, H),
        in_specs=[qkv_spec(0), qkv_spec(1), qkv_spec(2),
                  pl.BlockSpec((1, 1, S), lambda b, h: (b, 0, 0))],
        out_specs=pl.BlockSpec((1, 1, S, Dh), lambda b, h: (b, h, 0, 0)),
        compiler_params=pltpu.CompilerParams(
            dimension_semantics=("parallel", "parallel")),
    )(qkv_t, qkv_t, qkv_t, mask_add)


# ----------------------------------------------------------------------------
# SequenceGroupAggregating(mode='mean')
#   [CLS]/[SEP] strip is folded into the weight matrix (full-S columns), so no
#   stacked-hidden copy and no [:, 1:-1] slices are ever materialized in HBM.
# ----------------------------------------------------------------------------
def _agg_weight_kernel(idx_ref, w_ref):
    idx = idx_ref[0]                                   # (1, S), -1 = CLS/SEP/pad
    G, S = w_ref.shape[1], w_ref.shape[2]
    iota = jax.lax.broadcasted_iota(jnp.int32, (G, S), 0)
    onehot = (iota == idx).astype(jnp.float32)         # (G, S)
    counts = jnp.sum(onehot, axis=-1, keepdims=True)
    w_ref[0] = (onehot / jnp.maximum(counts, 1e-12)).astype(w_ref.dtype)


def _agg_apply_kernel(w_ref, h_ref, o_ref):
    o_ref[0] = jnp.dot(w_ref[0], h_ref[0], preferred_element_type=jnp.float32)


def pallas_group_agg_weights(idx_full, agg_step):
    """idx_full: (B, S) int32, position -> original token index (-1 elsewhere).
    Returns normalized one-hot weights (B, Gp, S) bf16, Gp = agg_step rounded to 8."""
    B, S = idx_full.shape
    Gp = _round_up(max(agg_step, 1), 8)
    idx3 = idx_full.astype(jnp.int32).reshape(B, 1, S)
    return pl.pallas_call(
        _agg_weight_kernel,
        out_shape=jax.ShapeDtypeStruct((B, Gp, S), jnp.bfloat16),
        grid=(B,),
        in_specs=[pl.BlockSpec((1, 1, S), lambda b: (b, 0, 0))],
        out_specs=pl.BlockSpec((1, Gp, S), lambda b: (b, 0, 0)),
        compiler_params=pltpu.CompilerParams(dimension_semantics=("parallel",)),
    )(idx3)


def pallas_group_agg_apply(weights, hidden, agg_step):
    """weights: (B, Gp, S) bf16, hidden: (B, S, D) bf16 -> (B, agg_step, D) f32."""
    B, Gp, S = weights.shape
    D = hidden.shape[-1]
    out = pl.pallas_call(
        _agg_apply_kernel,
        out_shape=jax.ShapeDtypeStruct((B, Gp, D), jnp.float32),
        grid=(B,),
        in_specs=[
            pl.BlockSpec((1, Gp, S), lambda b: (b, 0, 0)),
            pl.BlockSpec((1, S, D), lambda b: (b, 0, 0)),
        ],
        out_specs=pl.BlockSpec((1, Gp, D), lambda b: (b, 0, 0)),
        compiler_params=pltpu.CompilerParams(dimension_semantics=("parallel",)),
    )(weights, hidden.astype(jnp.bfloat16))
    return out[:, :agg_step, :]


# ----------------------------------------------------------------------------
# Synthetic BERT-like encoder parameters (deterministic, QKV pre-fused, bf16)
# ----------------------------------------------------------------------------
def make_params(key, vocab, max_pos, D, H, FF, L):
    def norm(k, shape, scale=0.02):
        return scale * jax.random.normal(k, shape, dtype=jnp.float32)

    keys = iter(jax.random.split(key, 2 + 6 * L))
    params = {
        "word_emb": norm(next(keys), (vocab, D)).astype(jnp.bfloat16),
        "pos_emb": norm(next(keys), (max_pos, D)).astype(jnp.bfloat16),
        "emb_ln_g": jnp.ones((D,), jnp.float32),
        "emb_ln_b": jnp.zeros((D,), jnp.float32),
        "layers": [],
    }
    for _ in range(L):
        wq, wk, wv = (norm(next(keys), (D, D)) for _ in range(3))
        lyr = {
            "w_qkv": jnp.concatenate([wq, wk, wv], axis=1).astype(jnp.bfloat16),
            "b_qkv": jnp.zeros((3 * D,), jnp.float32),
            "wo": norm(next(keys), (D, D)).astype(jnp.bfloat16),
            "bo": jnp.zeros((D,), jnp.float32),
            "ln1_g": jnp.ones((D,), jnp.float32), "ln1_b": jnp.zeros((D,), jnp.float32),
            "w1": norm(next(keys), (D, FF)).astype(jnp.bfloat16),
            "b1": jnp.zeros((FF,), jnp.float32),
            "w2": norm(next(keys), (FF, D)).astype(jnp.bfloat16),
            "b2": jnp.zeros((D,), jnp.float32),
            "ln2_g": jnp.ones((D,), jnp.float32), "ln2_b": jnp.zeros((D,), jnp.float32),
        }
        params["layers"].append(lyr)
    return params


# ----------------------------------------------------------------------------
# BertLikeEmbedder.forward
# ----------------------------------------------------------------------------
def bert_like_embedder_forward(params, sub_tok_ids, sub_mask, ori_indexes,
                               *, cfg, agg_step):
    B, S = sub_tok_ids.shape
    D, H = cfg["hid_dim"], cfg["num_heads"]
    Dh = D // H

    # --- bert_like(..., output_hidden_states=True) --------------------------
    # Embedding gather kept in plain JAX (glue); tables are bf16, the word+pos
    # add is fused into the (f32-math) LayerNorm kernel.
    # TODO(synk): token_type embeddings omitted (synthetic mirror of the frozen encoder).
    we = jnp.take(params["word_emb"], sub_tok_ids, axis=0)            # (B,S,D) bf16
    pe = jnp.broadcast_to(params["pos_emb"][None, :S, :], (B, S, D))
    x2 = pallas_add_layernorm(we.reshape(B * S, D), pe.reshape(B * S, D),
                              params["emb_ln_g"], params["emb_ln_b"])
    hidden_states = [x2.reshape(B, S, D)]

    mask_add = ((1.0 - sub_mask.astype(jnp.float32)) * (-1e9)).reshape(B, 1, S)

    for lyr in params["layers"]:
        h2 = hidden_states[-1].reshape(B * S, D)
        # fused QKV projection -> one head-major relayout (review option (b))
        qkv = pallas_dense(h2, lyr["w_qkv"], lyr["b_qkv"])             # (B*S, 3D)
        qkv_t = qkv.reshape(B, S, 3, H, Dh).transpose(2, 0, 3, 1, 4)  # (3,B,H,S,Dh)
        ctx = pallas_attention(qkv_t, mask_add)                        # (B,H,S,Dh)
        ctx2 = ctx.transpose(0, 2, 1, 3).reshape(B * S, D)
        attn_out = pallas_dense(ctx2, lyr["wo"], lyr["bo"])
        h2 = pallas_add_layernorm(h2, attn_out, lyr["ln1_g"], lyr["ln1_b"])
        ff = pallas_ffn(h2, lyr["w1"], lyr["b1"], lyr["w2"], lyr["b2"])
        h2 = pallas_add_layernorm(h2, ff, lyr["ln2_g"], lyr["ln2_b"])
        hidden_states.append(h2.reshape(B, S, D))

    # --- BertLikeEmbedder.forward body ---------------------------------------
    # Build the mean-aggregation weights once per batch; the CLS/SEP strip is
    # encoded as zero columns, so each hidden state is consumed full-S in place.
    T = ori_indexes.shape[1]
    idx_full = jnp.pad(ori_indexes.astype(jnp.int32),
                       ((0, 0), (1, S - 1 - T)), constant_values=-1)   # (B, S)
    weights = pallas_group_agg_weights(idx_full, agg_step)              # (B,Gp,S)

    all_bert_hidden = [pallas_group_agg_apply(weights, h, agg_step)
                       for h in hidden_states]
    bert_hidden = all_bert_hidden[-1]   # == group_agg(last_hidden_state[:,1:-1])
    return bert_hidden, all_bert_hidden


# ----------------------------------------------------------------------------
if __name__ == "__main__":
    key = jax.random.PRNGKey(0)

    # Small synthetic configuration (BERT-like): hidden=32, heads=4, layers=2.
    B, S = 2, 10            # batch, sub-token sequence length (incl. CLS/SEP)
    D, H, FF, L = 32, 4, 64, 2
    VOCAB = 99
    cfg = {"hid_dim": D, "num_heads": H}

    params = make_params(key, VOCAB, S, D, H, FF, L)

    # Batchified inputs as produced by BertLikeConfig.batchify:
    #   sub_tok_ids: [CLS] sub-tokens [SEP] padded with pad_id=0
    #   sub_mask:    True for real sub-tokens (incl. CLS/SEP)
    #   ori_indexes: per sub token (no CLS/SEP) original-token index, -1 padding
    sub_tok_ids = jnp.array(
        [[1, 11, 12, 13, 14, 15, 16, 17, 18, 2],
         [1, 21, 22, 23, 24, 25, 2, 0, 0, 0]], dtype=jnp.int32)
    sub_mask = jnp.array(
        [[True] * 10,
         [True] * 7 + [False] * 3], dtype=bool)
    ori_indexes = jnp.array(
        [[0, 0, 1, 2, 2, 2, 3, 4],
         [0, 1, 1, 2, 3, -1, -1, -1]], dtype=jnp.int32)
    agg_step = int(ori_indexes.max()) + 1           # 5 original tokens

    fwd = jax.jit(functools.partial(bert_like_embedder_forward,
                                    cfg=cfg, agg_step=agg_step))
    bert_hidden, all_bert_hidden = fwd(params, sub_tok_ids, sub_mask, ori_indexes)

    jax.block_until_ready(bert_hidden)
    for h in all_bert_hidden:
        jax.block_until_ready(h)

    assert bert_hidden.shape == (B, agg_step, D)
    assert len(all_bert_hidden) == L + 1
    assert all(h.shape == (B, agg_step, D) for h in all_bert_hidden)
    print("KERNEL_OK")
</pallas_src>

<mosaic_0001>
module attributes {stable_mosaic.version = 11 : i64} {
  func.func @_add_ln_kernel(%arg0: i32, %arg1: memref<24x32xbf16, #tpu.memory_space<vmem>>, %arg2: memref<24x32xbf16, #tpu.memory_space<vmem>>, %arg3: memref<1x32xf32, #tpu.memory_space<vmem>>, %arg4: memref<1x32xf32, #tpu.memory_space<vmem>>, %arg5: memref<24x32xbf16, #tpu.memory_space<vmem>>) attributes {dimension_semantics = [#tpu.dimension_semantics<parallel>], iteration_bounds = array<i64: 1>, scalar_prefetch = 0 : i64, scratch_operands = 0 : i64, tpu.core_type = #tpu.core_type<tc>, window_params = [{transform_indices = @transform_0, window_bounds = array<i64: 24, 32>}, {transform_indices = @transform_1, window_bounds = array<i64: 24, 32>}, {pipeline_mode = #tpu.pipeline_mode<synchronous>, transform_indices = @transform_2, window_bounds = array<i64: 1, 32>}, {pipeline_mode = #tpu.pipeline_mode<synchronous>, transform_indices = @transform_3, window_bounds = array<i64: 1, 32>}, {transform_indices = @transform_4, window_bounds = array<i64: 24, 32>}]} {
    %c0 = arith.constant 0 : index
    %c0_0 = arith.constant 0 : index
    %0 = vector.load %arg1[%c0, %c0_0] : memref<24x32xbf16, #tpu.memory_space<vmem>>, vector<24x32xbf16>
    %1 = arith.extf %0 : vector<24x32xbf16> to vector<24x32xf32>
    %c0_1 = arith.constant 0 : index
    %c0_2 = arith.constant 0 : index
    %2 = vector.load %arg2[%c0_1, %c0_2] : memref<24x32xbf16, #tpu.memory_space<vmem>>, vector<24x32xbf16>
    %3 = arith.extf %2 : vector<24x32xbf16> to vector<24x32xf32>
    %4 = arith.addf %1, %3 : vector<24x32xf32>
    %cst = arith.constant dense<0.000000e+00> : vector<24xf32>
    %5 = vector.multi_reduction <add>, %4, %cst [1] : vector<24x32xf32> to vector<24xf32>
    %6 = vector.shape_cast %5 : vector<24xf32> to vector<24x1xf32>
    %cst_3 = arith.constant 3.200000e+01 : f32
    %7 = vector.broadcast %cst_3 : f32 to vector<24x1xf32>
    %8 = arith.divf %6, %7 : vector<24x1xf32>
    %9 = vector.broadcast %8 : vector<24x1xf32> to vector<24x32xf32>
    %10 = arith.subf %4, %9 : vector<24x32xf32>
    %11 = arith.mulf %10, %10 : vector<24x32xf32>
    %cst_4 = arith.constant dense<0.000000e+00> : vector<24xf32>
    %12 = vector.multi_reduction <add>, %11, %cst_4 [1] : vector<24x32xf32> to vector<24xf32>
    %13 = vector.shape_cast %12 : vector<24xf32> to vector<24x1xf32>
    %cst_5 = arith.constant 3.200000e+01 : f32
    %14 = vector.broadcast %cst_5 : f32 to vector<24x1xf32>
    %15 = arith.divf %13, %14 : vector<24x1xf32>
    %cst_6 = arith.constant 9.99999996E-13 : f32
    %16 = vector.broadcast %cst_6 : f32 to vector<24x1xf32>
    %17 = arith.addf %15, %16 : vector<24x1xf32>
    %18 = math.rsqrt %17 : vector<24x1xf32>
    %19 = vector.broadcast %18 : vector<24x1xf32> to vector<24x32xf32>
    %20 = arith.mulf %10, %19 : vector<24x32xf32>
    %c0_7 = arith.constant 0 : index
    %c0_8 = arith.constant 0 : index
    %21 = vector.load %arg3[%c0_7, %c0_8] : memref<1x32xf32, #tpu.memory_space<vmem>>, vector<1x32xf32>
    %22 = vector.broadcast %21 : vector<1x32xf32> to vector<24x32xf32>
    %23 = arith.mulf %20, %22 : vector<24x32xf32>
    %c0_9 = arith.constant 0 : index
    %c0_10 = arith.constant 0 : index
    %24 = vector.load %arg4[%c0_9, %c0_10] : memref<1x32xf32, #tpu.memory_space<vmem>>, vector<1x32xf32>
    %25 = vector.broadcast %24 : vector<1x32xf32> to vector<24x32xf32>
    %26 = arith.addf %23, %25 : vector<24x32xf32>
    %27 = arith.truncf %26 : vector<24x32xf32> to vector<24x32xbf16>
    %c0_11 = arith.constant 0 : index
    %c0_12 = arith.constant 0 : index
    %28 = vector.load %arg5[%c0_11, %c0_12] : memref<24x32xbf16, #tpu.memory_space<vmem>>, vector<24x32xbf16>
    tpu.vector_store %arg5[%c0_11, %c0_12], %27 {strides = array<i32>} : memref<24x32xbf16, #tpu.memory_space<vmem>>, vector<24x32xbf16>,
    return
  }
  func.func @transform_0(%arg0: i32) -> (i32, i32) {
    %c0_i32 = arith.constant 0 : i32
    %c0_i32_0 = arith.constant 0 : i32
    return %arg0, %c0_i32 : i32, i32
  }
  func.func @transform_1(%arg0: i32) -> (i32, i32) {
    %c0_i32 = arith.constant 0 : i32
    %c0_i32_0 = arith.constant 0 : i32
    return %arg0, %c0_i32 : i32, i32
  }
  func.func @transform_2(%arg0: i32) -> (i32, i32) {
    %c0_i32 = arith.constant 0 : i32
    %c0_i32_0 = arith.constant 0 : i32
    %c0_i32_1 = arith.constant 0 : i32
    return %c0_i32, %c0_i32_0 : i32, i32
  }
  func.func @transform_3(%arg0: i32) -> (i32, i32) {
    %c0_i32 = arith.constant 0 : i32
    %c0_i32_0 = arith.constant 0 : i32
    %c0_i32_1 = arith.constant 0 : i32
    return %c0_i32, %c0_i32_0 : i32, i32
  }
  func.func @transform_4(%arg0: i32) -> (i32, i32) {
    %c0_i32 = arith.constant 0 : i32
    %c0_i32_0 = arith.constant 0 : i32
    return %arg0, %c0_i32 : i32, i32
  }
}

module attributes {stable_mosaic.version = 11 : i64} {
  func.func @_dense_kernel(%arg0: i32, %arg1: i32, %arg2: i32, %arg3: memref<24x128xbf16, #tpu.memory_space<vmem>>, %arg4: memref<128x128xbf16, #tpu.memory_space<vmem>>, %arg5: memref<1x128xf32, #tpu.memory_space<vmem>>, %arg6: memref<24x128xbf16, #tpu.memory_space<vmem>>, %arg7: memref<24x128xf32, #tpu.memory_space<vmem>>) attributes {dimension_semantics = [#tpu.dimension_semantics<parallel>, #tpu.dimension_semantics<parallel>, #tpu.dimension_semantics<arbitrary>], iteration_bounds = array<i64: 1, 1, 1>, scalar_prefetch = 0 : i64, scratch_operands = 1 : i64, tpu.core_type = #tpu.core_type<tc>, window_params = [{transform_indices = @transform_0, window_bounds = array<i64: 24, 128>}, {transform_indices = @transform_1, window_bounds = array<i64: 128, 128>}, {transform_indices = @transform_2, window_bounds = array<i64: 1, 128>}, {transform_indices = @transform_3, window_bounds = array<i64: 24, 128>}]} {
    %c0_i32 = arith.constant 0 : i32
    %0 = arith.cmpi eq, %arg2, %c0_i32 : i32
    %1 = arith.extui %0 : i1 to i32
    %c0_i32_0 = arith.constant 0 : i32
    %2 = arith.cmpi ne, %1, %c0_i32_0 : i32
    scf.if %2 {
      %cst_10 = arith.constant 0.000000e+00 : f32
      %12 = vector.broadcast %cst_10 : f32 to vector<24x128xf32>
      %c0_11 = arith.constant 0 : index
      %c0_12 = arith.constant 0 : index
      %13 = vector.load %arg7[%c0_11, %c0_12] : memref<24x128xf32, #tpu.memory_space<vmem>>, vector<24x128xf32>
      tpu.vector_store %arg7[%c0_11, %c0_12], %12 {strides = array<i32>} : memref<24x128xf32, #tpu.memory_space<vmem>>, vector<24x128xf32>,
    } else {
    }
    %c0 = arith.constant 0 : index
    %c0_1 = arith.constant 0 : index
    %3 = vector.load %arg7[%c0, %c0_1] : memref<24x128xf32, #tpu.memory_space<vmem>>, vector<24x128xf32>
    %c0_2 = arith.constant 0 : index
    %c0_3 = arith.constant 0 : index
    %4 = vector.load %arg3[%c0_2, %c0_3] : memref<24x128xbf16, #tpu.memory_space<vmem>>, vector<24x128xbf16>
    %c0_4 = arith.constant 0 : index
    %c0_5 = arith.constant 0 : index
    %5 = vector.load %arg4[%c0_4, %c0_5] : memref<128x128xbf16, #tpu.memory_space<vmem>>, vector<128x128xbf16>
    %cst = arith.constant dense<0.000000e+00> : vector<24x128xf32>
    %6 = tpu.matmul %4, %5, %cst {dimension_numbers = #tpu.dot_dimension_numbers<[1], [0], [0], [1], [0, 0, 1, 1], [], []>} : vector<24x128xbf16>, vector<128x128xbf16>, vector<24x128xf32> -> vector<24x128xf32>
    %7 = arith.addf %3, %6 : vector<24x128xf32>
    %c0_6 = arith.constant 0 : index
    %c0_7 = arith.constant 0 : index
    %8 = vector.load %arg7[%c0_6, %c0_7] : memref<24x128xf32, #tpu.memory_space<vmem>>, vector<24x128xf32>
    tpu.vector_store %arg7[%c0_6, %c0_7], %7 {strides = array<i32>} : memref<24x128xf32, #tpu.memory_space<vmem>>, vector<24x128xf32>,
    %c0_i32_8 = arith.constant 0 : i32
    %9 = arith.cmpi eq, %arg2, %c0_i32_8 : i32
    %10 = arith.extui %9 : i1 to i32
    %c0_i32_9 = arith.constant 0 : i32
    %11 = arith.cmpi ne, %10, %c0_i32_9 : i32
    scf.if %11 {
      %c0_10 = arith.constant 0 : index
      %c0_11 = arith.constant 0 : index
      %12 = vector.load %arg7[%c0_10, %c0_11] : memref<24x128xf32, #tpu.memory_space<vmem>>, vector<24x128xf32>
      %c0_12 = arith.constant 0 : index
      %c0_13 = arith.constant 0 : index
      %13 = vector.load %arg5[%c0_12, %c0_13] : memref<1x128xf32, #tpu.memory_space<vmem>>, vector<1x128xf32>
      %14 = vector.broadcast %13 : vector<1x128xf32> to vector<24x128xf32>
      %15 = arith.addf %12, %14 : vector<24x128xf32>
      %16 = arith.truncf %15 : vector<24x128xf32> to vector<24x128xbf16>
      %c0_14 = arith.constant 0 : index
      %c0_15 = arith.constant 0 : index
      %17 = vector.load %arg6[%c0_14, %c0_15] : memref<24x128xbf16, #tpu.memory_space<vmem>>, vector<24x128xbf16>
      tpu.vector_store %arg6[%c0_14, %c0_15], %16 {strides = array<i32>} : memref<24x128xbf16, #tpu.memory_space<vmem>>, vector<24x128xbf16>,
    } else {
    }
    return
  }
  func.func @transform_0(%arg0: i32, %arg1: i32, %arg2: i32) -> (i32, i32) {
    %c0_i32 = arith.constant 0 : i32
    return %arg0, %arg2 : i32, i32
  }
  func.func @transform_1(%arg0: i32, %arg1: i32, %arg2: i32) -> (i32, i32) {
    %c0_i32 = arith.constant 0 : i32
    return %arg2, %arg1 : i32, i32
  }
  func.func @transform_2(%arg0: i32, %arg1: i32, %arg2: i32) -> (i32, i32) {
    %c0_i32 = arith.constant 0 : i32
    %c0_i32_0 = arith.constant 0 : i32
    return %c0_i32, %arg1 : i32, i32
  }
  func.func @transform_3(%arg0: i32, %arg1: i32, %arg2: i32) -> (i32, i32) {
    %c0_i32 = arith.constant 0 : i32
    return %arg0, %arg1 : i32, i32
  }
}

module attributes {stable_mosaic.version = 11 : i64} {
  func.func @_attention_kernel(%arg0: i32, %arg1: i32, %arg2: memref<1x1x1x10x8xbf16, #tpu.memory_space<vmem>>, %arg3: memref<1x1x1x10x8xbf16, #tpu.memory_space<vmem>>, %arg4: memref<1x1x1x10x8xbf16, #tpu.memory_space<vmem>>, %arg5: memref<1x1x10xf32, #tpu.memory_space<vmem>>, %arg6: memref<1x1x10x8xbf16, #tpu.memory_space<vmem>>) attributes {dimension_semantics = [#tpu.dimension_semantics<parallel>, #tpu.dimension_semantics<parallel>], iteration_bounds = array<i64: 2, 4>, scalar_prefetch = 0 : i64, scratch_operands = 0 : i64, tpu.core_type = #tpu.core_type<tc>, window_params = [{transform_indices = @transform_0, window_bounds = array<i64: 1, 1, 1, 10, 8>}, {transform_indices = @transform_1, window_bounds = array<i64: 1, 1, 1, 10, 8>}, {transform_indices = @transform_2, window_bounds = array<i64: 1, 1, 1, 10, 8>}, {transform_indices = @transform_3, window_bounds = array<i64: 1, 1, 10>}, {transform_indices = @transform_4, window_bounds = array<i64: 1, 1, 10, 8>}]} {
    %c0 = arith.constant 0 : index
    %c0_0 = arith.constant 0 : index
    %c0_1 = arith.constant 0 : index
    %c0_2 = arith.constant 0 : index
    %c0_3 = arith.constant 0 : index
    %0 = vector.load %arg2[%c0, %c0_0, %c0_1, %c0_2, %c0_3] : memref<1x1x1x10x8xbf16, #tpu.memory_space<vmem>>, vector<1x1x1x10x8xbf16>
    %1 = vector.shape_cast %0 : vector<1x1x1x10x8xbf16> to vector<10x8xbf16>
    %cst = arith.constant 3.535160e-01 : bf16
    %2 = vector.broadcast %cst : bf16 to vector<10x8xbf16>
    %3 = arith.mulf %1, %2 : vector<10x8xbf16>
    %c0_4 = arith.constant 0 : index
    %c0_5 = arith.constant 0 : index
    %c0_6 = arith.constant 0 : index
    %c0_7 = arith.constant 0 : index
    %c0_8 = arith.constant 0 : index
    %4 = vector.load %arg3[%c0_4, %c0_5, %c0_6, %c0_7, %c0_8] : memref<1x1x1x10x8xbf16, #tpu.memory_space<vmem>>, vector<1x1x1x10x8xbf16>
    %5 = vector.shape_cast %4 : vector<1x1x1x10x8xbf16> to vector<10x8xbf16>
    %c0_9 = arith.constant 0 : index
    %c0_10 = arith.constant 0 : index
    %c0_11 = arith.constant 0 : index
    %c0_12 = arith.constant 0 : index
    %c0_13 = arith.constant 0 : index
    %6 = vector.load %arg4[%c0_9, %c0_10, %c0_11, %c0_12, %c0_13] : memref<1x1x1x10x8xbf16, #tpu.memory_space<vmem>>, vector<1x1x1x10x8xbf16>
    %7 = vector.shape_cast %6 : vector<1x1x1x10x8xbf16> to vector<10x8xbf16>
    %c0_14 = arith.constant 0 : index
    %c0_15 = arith.constant 0 : index
    %c0_16 = arith.constant 0 : index
    %8 = vector.load %arg5[%c0_14, %c0_15, %c0_16] : memref<1x1x10xf32, #tpu.memory_space<vmem>>, vector<1x1x10xf32>
    %9 = vector.shape_cast %8 : vector<1x1x10xf32> to vector<1x10xf32>
    %cst_17 = arith.constant dense<0.000000e+00> : vector<10x10xf32>
    %10 = tpu.matmul %3, %5, %cst_17 {dimension_numbers = #tpu.dot_dimension_numbers<[1], [1], [0], [0], [0, 0, 1, 0], [], []>} : vector<10x8xbf16>, vector<10x8xbf16>, vector<10x10xf32> -> vector<10x10xf32>
    %11 = vector.broadcast %9 : vector<1x10xf32> to vector<10x10xf32>
    %12 = arith.addf %10, %11 : vector<10x10xf32>
    %cst_18 = arith.constant dense<0xFF800000> : vector<10xf32>
    %13 = vector.multi_reduction <maximumf>, %12, %cst_18 [1] : vector<10x10xf32> to vector<10xf32>
    %14 = vector.shape_cast %13 : vector<10xf32> to vector<10x1xf32>
    %15 = vector.broadcast %14 : vector<10x1xf32> to vector<10x10xf32>
    %16 = arith.subf %12, %15 : vector<10x10xf32>
    %17 = math.exp %16 : vector<10x10xf32>
    %cst_19 = arith.constant dense<0.000000e+00> : vector<10xf32>
    %18 = vector.multi_reduction <add>, %17, %cst_19 [1] : vector<10x10xf32> to vector<10xf32>
    %19 = vector.shape_cast %18 : vector<10xf32> to vector<10x1xf32>
    %20 = tpu.reciprocal %19 {approx = true} : vector<10x1xf32> -> vector<10x1xf32>
    %21 = vector.broadcast %20 : vector<10x1xf32> to vector<10x10xf32>
    %22 = arith.mulf %17, %21 : vector<10x10xf32>
    %23 = arith.truncf %22 : vector<10x10xf32> to vector<10x10xbf16>
    %cst_20 = arith.constant dense<0.000000e+00> : vector<10x8xf32>
    %24 = tpu.matmul %23, %7, %cst_20 {dimension_numbers = #tpu.dot_dimension_numbers<[1], [0], [0], [1], [0, 0, 1, 1], [], []>} : vector<10x10xbf16>, vector<10x8xbf16>, vector<10x8xf32> -> vector<10x8xf32>
    %25 = arith.truncf %24 : vector<10x8xf32> to vector<10x8xbf16>
    %c0_21 = arith.constant 0 : index
    %c0_22 = arith.constant 0 : index
    %c0_23 = arith.constant 0 : index
    %c0_24 = arith.constant 0 : index
    %26 = vector.load %arg6[%c0_21, %c0_22, %c0_23, %c0_24] : memref<1x1x10x8xbf16, #tpu.memory_space<vmem>>, vector<1x1x10x8xbf16>
    %27 = vector.shape_cast %26 : vector<1x1x10x8xbf16> to vector<10x8xbf16>
    %28 = vector.shape_cast %25 : vector<10x8xbf16> to vector<1x1x10x8xbf16>
    tpu.vector_store %arg6[%c0_21, %c0_22, %c0_23, %c0_24], %28 {strides = array<i32>} : memref<1x1x10x8xbf16, #tpu.memory_space<vmem>>, vector<1x1x10x8xbf16>,
    return
  }
  func.func @transform_0(%arg0: i32, %arg1: i32) -> (i32, i32, i32, i32, i32) {
    %c0_i32 = arith.constant 0 : i32
    %c0_i32_0 = arith.constant 0 : i32
    %c0_i32_1 = arith.constant 0 : i32
    %c0_i32_2 = arith.constant 0 : i32
    return %c0_i32, %arg0, %arg1, %c0_i32_0, %c0_i32_1 : i32, i32, i32, i32, i32
  }
  func.func @transform_1(%arg0: i32, %arg1: i32) -> (i32, i32, i32, i32, i32) {
    %c1_i32 = arith.constant 1 : i32
    %c0_i32 = arith.constant 0 : i32
    %c0_i32_0 = arith.constant 0 : i32
    %c0_i32_1 = arith.constant 0 : i32
    return %c1_i32, %arg0, %arg1, %c0_i32, %c0_i32_0 : i32, i32, i32, i32, i32
  }
  func.func @transform_2(%arg0: i32, %arg1: i32) -> (i32, i32, i32, i32, i32) {
    %c2_i32 = arith.constant 2 : i32
    %c0_i32 = arith.constant 0 : i32
    %c0_i32_0 = arith.constant 0 : i32
    %c0_i32_1 = arith.constant 0 : i32
    return %c2_i32, %arg0, %arg1, %c0_i32, %c0_i32_0 : i32, i32, i32, i32, i32
  }
  func.func @transform_3(%arg0: i32, %arg1: i32) -> (i32, i32, i32) {
    %c0_i32 = arith.constant 0 : i32
    %c0_i32_0 = arith.constant 0 : i32
    %c0_i32_1 = arith.constant 0 : i32
    return %arg0, %c0_i32, %c0_i32_0 : i32, i32, i32
  }
  func.func @transform_4(%arg0: i32, %arg1: i32) -> (i32, i32, i32, i32) {
    %c0_i32 = arith.constant 0 : i32
    %c0_i32_0 = arith.constant 0 : i32
    %c0_i32_1 = arith.constant 0 : i32
    return %arg0, %arg1, %c0_i32, %c0_i32_0 : i32, i32, i32, i32
  }
}

module attributes {stable_mosaic.version = 11 : i64} {
  func.func @_agg_weight_kernel(%arg0: i32, %arg1: memref<1x1x10xi32, #tpu.memory_space<vmem>>, %arg2: memref<1x8x10xbf16, #tpu.memory_space<vmem>>) attributes {dimension_semantics = [#tpu.dimension_semantics<parallel>], iteration_bounds = array<i64: 2>, scalar_prefetch = 0 : i64, scratch_operands = 0 : i64, tpu.core_type = #tpu.core_type<tc>, window_params = [{transform_indices = @transform_0, window_bounds = array<i64: 1, 1, 10>}, {transform_indices = @transform_1, window_bounds = array<i64: 1, 8, 10>}]} {
    %c0 = arith.constant 0 : index
    %c0_0 = arith.constant 0 : index
    %c0_1 = arith.constant 0 : index
    %0 = vector.load %arg1[%c0, %c0_0, %c0_1] : memref<1x1x10xi32, #tpu.memory_space<vmem>>, vector<1x1x10xi32>
    %1 = vector.shape_cast %0 : vector<1x1x10xi32> to vector<1x10xi32>
    %2 = tpu.iota {dimensions = array<i32: 0>} : vector<8x10xi32>
    %3 = vector.broadcast %1 : vector<1x10xi32> to vector<8x10xi32>
    %4 = arith.cmpi eq, %2, %3 : vector<8x10xi32>
    %5 = arith.extui %4 : vector<8x10xi1> to vector<8x10xi32>
    %6 = arith.sitofp %5 : vector<8x10xi32> to vector<8x10xf32>
    %cst = arith.constant dense<0.000000e+00> : vector<8xf32>
    %7 = vector.multi_reduction <add>, %6, %cst [1] : vector<8x10xf32> to vector<8xf32>
    %8 = vector.shape_cast %7 : vector<8xf32> to vector<8x1xf32>
    %cst_2 = arith.constant 9.99999996E-13 : f32
    %9 = vector.broadcast %cst_2 : f32 to vector<8x1xf32>
    %10 = arith.maximumf %8, %9 : vector<8x1xf32>
    %11 = vector.broadcast %10 : vector<8x1xf32> to vector<8x10xf32>
    %12 = arith.divf %6, %11 : vector<8x10xf32>
    %13 = arith.truncf %12 : vector<8x10xf32> to vector<8x10xbf16>
    %c0_3 = arith.constant 0 : index
    %c0_4 = arith.constant 0 : index
    %c0_5 = arith.constant 0 : index
    %14 = vector.load %arg2[%c0_3, %c0_4, %c0_5] : memref<1x8x10xbf16, #tpu.memory_space<vmem>>, vector<1x8x10xbf16>
    %15 = vector.shape_cast %14 : vector<1x8x10xbf16> to vector<8x10xbf16>
    %16 = vector.shape_cast %13 : vector<8x10xbf16> to vector<1x8x10xbf16>
    tpu.vector_store %arg2[%c0_3, %c0_4, %c0_5], %16 {strides = array<i32>} : memref<1x8x10xbf16, #tpu.memory_space<vmem>>, vector<1x8x10xbf16>,
    return
  }
  func.func @transform_0(%arg0: i32) -> (i32, i32, i32) {
    %c0_i32 = arith.constant 0 : i32
    %c0_i32_0 = arith.constant 0 : i32
    %c0_i32_1 = arith.constant 0 : i32
    return %arg0, %c0_i32, %c0_i32_0 : i32, i32, i32
  }
  func.func @transform_1(%arg0: i32) -> (i32, i32, i32) {
    %c0_i32 = arith.constant 0 : i32
    %c0_i32_0 = arith.constant 0 : i32
    %c0_i32_1 = arith.constant 0 : i32
    return %arg0, %c0_i32, %c0_i32_0 : i32, i32, i32
  }
}

module attributes {stable_mosaic.version = 11 : i64} {
  func.func @_agg_apply_kernel(%arg0: i32, %arg1: memref<1x8x10xbf16, #tpu.memory_space<vmem>>, %arg2: memref<1x10x32xbf16, #tpu.memory_space<vmem>>, %arg3: memref<1x8x32xf32, #tpu.memory_space<vmem>>) attributes {dimension_semantics = [#tpu.dimension_semantics<parallel>], iteration_bounds = array<i64: 2>, scalar_prefetch = 0 : i64, scratch_operands = 0 : i64, tpu.core_type = #tpu.core_type<tc>, window_params = [{transform_indices = @transform_0, window_bounds = array<i64: 1, 8, 10>}, {transform_indices = @transform_1, window_bounds = array<i64: 1, 10, 32>}, {transform_indices = @transform_2, window_bounds = array<i64: 1, 8, 32>}]} {
    %c0 = arith.constant 0 : index
    %c0_0 = arith.constant 0 : index
    %c0_1 = arith.constant 0 : index
    %0 = vector.load %arg1[%c0, %c0_0, %c0_1] : memref<1x8x10xbf16, #tpu.memory_space<vmem>>, vector<1x8x10xbf16>
    %1 = vector.shape_cast %0 : vector<1x8x10xbf16> to vector<8x10xbf16>
    %c0_2 = arith.constant 0 : index
    %c0_3 = arith.constant 0 : index
    %c0_4 = arith.constant 0 : index
    %2 = vector.load %arg2[%c0_2, %c0_3, %c0_4] : memref<1x10x32xbf16, #tpu.memory_space<vmem>>, vector<1x10x32xbf16>
    %3 = vector.shape_cast %2 : vector<1x10x32xbf16> to vector<10x32xbf16>
    %cst = arith.constant dense<0.000000e+00> : vector<8x32xf32>
    %4 = tpu.matmul %1, %3, %cst {dimension_numbers = #tpu.dot_dimension_numbers<[1], [0], [0], [1], [0, 0, 1, 1], [], []>} : vector<8x10xbf16>, vector<10x32xbf16>, vector<8x32xf32> -> vector<8x32xf32>
    %c0_5 = arith.constant 0 : index
    %c0_6 = arith.constant 0 : index
    %c0_7 = arith.constant 0 : index
    %5 = vector.load %arg3[%c0_5, %c0_6, %c0_7] : memref<1x8x32xf32, #tpu.memory_space<vmem>>, vector<1x8x32xf32>
    %6 = vector.shape_cast %5 : vector<1x8x32xf32> to vector<8x32xf32>
    %7 = vector.shape_cast %4 : vector<8x32xf32> to vector<1x8x32xf32>
    tpu.vector_store %arg3[%c0_5, %c0_6, %c0_7], %7 {strides = array<i32>} : memref<1x8x32xf32, #tpu.memory_space<vmem>>, vector<1x8x32xf32>,
    return
  }
  func.func @transform_0(%arg0: i32) -> (i32, i32, i32) {
    %c0_i32 = arith.constant 0 : i32
    %c0_i32_0 = arith.constant 0 : i32
    %c0_i32_1 = arith.constant 0 : i32
    return %arg0, %c0_i32, %c0_i32_0 : i32, i32, i32
  }
  func.func @transform_1(%arg0: i32) -> (i32, i32, i32) {
    %c0_i32 = arith.constant 0 : i32
    %c0_i32_0 = arith.constant 0 : i32
    %c0_i32_1 = arith.constant 0 : i32
    return %arg0, %c0_i32, %c0_i32_0 : i32, i32, i32
  }
  func.func @transform_2(%arg0: i32) -> (i32, i32, i32) {
    %c0_i32 = arith.constant 0 : i32
    %c0_i32_0 = arith.constant 0 : i32
    %c0_i32_1 = arith.constant 0 : i32
    return %arg0, %c0_i32, %c0_i32_0 : i32, i32, i32
  }
}

module attributes {stable_mosaic.version = 11 : i64} {
  func.func @_ffn_kernel(%arg0: i32, %arg1: i32, %arg2: memref<24x32xbf16, #tpu.memory_space<vmem>>, %arg3: memref<32x128xbf16, #tpu.memory_space<vmem>>, %arg4: memref<1x128xf32, #tpu.memory_space<vmem>>, %arg5: memref<128x32xbf16, #tpu.memory_space<vmem>>, %arg6: memref<1x32xf32, #tpu.memory_space<vmem>>, %arg7: memref<24x32xbf16, #tpu.memory_space<vmem>>, %arg8: memref<24x32xf32, #tpu.memory_space<vmem>>) attributes {dimension_semantics = [#tpu.dimension_semantics<parallel>, #tpu.dimension_semantics<arbitrary>], iteration_bounds = array<i64: 1, 1>, scalar_prefetch = 0 : i64, scratch_operands = 1 : i64, tpu.core_type = #tpu.core_type<tc>, window_params = [{transform_indices = @transform_0, window_bounds = array<i64: 24, 32>}, {transform_indices = @transform_1, window_bounds = array<i64: 32, 128>}, {transform_indices = @transform_2, window_bounds = array<i64: 1, 128>}, {transform_indices = @transform_3, window_bounds = array<i64: 128, 32>}, {pipeline_mode = #tpu.pipeline_mode<synchronous>, transform_indices = @transform_4, window_bounds = array<i64: 1, 32>}, {transform_indices = @transform_5, window_bounds = array<i64: 24, 32>}]} {
    %c0_i32 = arith.constant 0 : i32
    %0 = arith.cmpi eq, %arg1, %c0_i32 : i32
    %1 = arith.extui %0 : i1 to i32
    %c0_i32_0 = arith.constant 0 : i32
    %2 = arith.cmpi ne, %1, %c0_i32_0 : i32
    scf.if %2 {
      %cst_19 = arith.constant 0.000000e+00 : f32
      %31 = vector.broadcast %cst_19 : f32 to vector<24x32xf32>
      %c0_20 = arith.constant 0 : index
      %c0_21 = arith.constant 0 : index
      %32 = vector.load %arg8[%c0_20, %c0_21] : memref<24x32xf32, #tpu.memory_space<vmem>>, vector<24x32xf32>
      tpu.vector_store %arg8[%c0_20, %c0_21], %31 {strides = array<i32>} : memref<24x32xf32, #tpu.memory_space<vmem>>, vector<24x32xf32>,
    } else {
    }
    %c0 = arith.constant 0 : index
    %c0_1 = arith.constant 0 : index
    %3 = vector.load %arg2[%c0, %c0_1] : memref<24x32xbf16, #tpu.memory_space<vmem>>, vector<24x32xbf16>
    %c0_2 = arith.constant 0 : index
    %c0_3 = arith.constant 0 : index
    %4 = vector.load %arg3[%c0_2, %c0_3] : memref<32x128xbf16, #tpu.memory_space<vmem>>, vector<32x128xbf16>
    %cst = arith.constant dense<0.000000e+00> : vector<24x128xf32>
    %5 = tpu.matmul %3, %4, %cst {dimension_numbers = #tpu.dot_dimension_numbers<[1], [0], [0], [1], [0, 0, 1, 1], [], []>} : vector<24x32xbf16>, vector<32x128xbf16>, vector<24x128xf32> -> vector<24x128xf32>
    %c0_4 = arith.constant 0 : index
    %c0_5 = arith.constant 0 : index
    %6 = vector.load %arg4[%c0_4, %c0_5] : memref<1x128xf32, #tpu.memory_space<vmem>>, vector<1x128xf32>
    %7 = vector.broadcast %6 : vector<1x128xf32> to vector<24x128xf32>
    %8 = arith.addf %5, %7 : vector<24x128xf32>
    %9 = arith.mulf %8, %8 : vector<24x128xf32>
    %10 = arith.mulf %8, %9 : vector<24x128xf32>
    %cst_6 = arith.constant 4.471500e-02 : f32
    %11 = vector.broadcast %cst_6 : f32 to vector<24x128xf32>
    %12 = arith.mulf %11, %10 : vector<24x128xf32>
    %13 = arith.addf %8, %12 : vector<24x128xf32>
    %cst_7 = arith.constant 0.797884583 : f32
    %14 = vector.broadcast %cst_7 : f32 to vector<24x128xf32>
    %15 = arith.mulf %14, %13 : vector<24x128xf32>
    %16 = math.tanh %15 : vector<24x128xf32>
    %cst_8 = arith.constant 1.000000e+00 : f32
    %17 = vector.broadcast %cst_8 : f32 to vector<24x128xf32>
    %18 = arith.addf %17, %16 : vector<24x128xf32>
    %cst_9 = arith.constant 5.000000e-01 : f32
    %19 = vector.broadcast %cst_9 : f32 to vector<24x128xf32>
    %20 = arith.mulf %19, %18 : vector<24x128xf32>
    %21 = arith.mulf %8, %20 : vector<24x128xf32>
    %c0_10 = arith.constant 0 : index
    %c0_11 = arith.constant 0 : index
    %22 = vector.load %arg8[%c0_10, %c0_11] : memref<24x32xf32, #tpu.memory_space<vmem>>, vector<24x32xf32>
    %23 = arith.truncf %21 : vector<24x128xf32> to vector<24x128xbf16>
    %c0_12 = arith.constant 0 : index
    %c0_13 = arith.constant 0 : index
    %24 = vector.load %arg5[%c0_12, %c0_13] : memref<128x32xbf16, #tpu.memory_space<vmem>>, vector<128x32xbf16>
    %cst_14 = arith.constant dense<0.000000e+00> : vector<24x32xf32>
    %25 = tpu.matmul %23, %24, %cst_14 {dimension_numbers = #tpu.dot_dimension_numbers<[1], [0], [0], [1], [0, 0, 1, 1], [], []>} : vector<24x128xbf16>, vector<128x32xbf16>, vector<24x32xf32> -> vector<24x32xf32>
    %26 = arith.addf %22, %25 : vector<24x32xf32>
    %c0_15 = arith.constant 0 : index
    %c0_16 = arith.constant 0 : index
    %27 = vector.load %arg8[%c0_15, %c0_16] : memref<24x32xf32, #tpu.memory_space<vmem>>, vector<24x32xf32>
    tpu.vector_store %arg8[%c0_15, %c0_16], %26 {strides = array<i32>} : memref<24x32xf32, #tpu.memory_space<vmem>>, vector<24x32xf32>,
    %c0_i32_17 = arith.constant 0 : i32
    %28 = arith.cmpi eq, %arg1, %c0_i32_17 : i32
    %29 = arith.extui %28 : i1 to i32
    %c0_i32_18 = arith.constant 0 : i32
    %30 = arith.cmpi ne, %29, %c0_i32_18 : i32
    scf.if %30 {
      %c0_19 = arith.constant 0 : index
      %c0_20 = arith.constant 0 : index
      %31 = vector.load %arg8[%c0_19, %c0_20] : memref<24x32xf32, #tpu.memory_space<vmem>>, vector<24x32xf32>
      %c0_21 = arith.constant 0 : index
      %c0_22 = arith.constant 0 : index
      %32 = vector.load %arg6[%c0_21, %c0_22] : memref<1x32xf32, #tpu.memory_space<vmem>>, vector<1x32xf32>
      %33 = vector.broadcast %32 : vector<1x32xf32> to vector<24x32xf32>
      %34 = arith.addf %31, %33 : vector<24x32xf32>
      %35 = arith.truncf %34 : vector<24x32xf32> to vector<24x32xbf16>
      %c0_23 = arith.constant 0 : index
      %c0_24 = arith.constant 0 : index
      %36 = vector.load %arg7[%c0_23, %c0_24] : memref<24x32xbf16, #tpu.memory_space<vmem>>, vector<24x32xbf16>
      tpu.vector_store %arg7[%c0_23, %c0_24], %35 {strides = array<i32>} : memref<24x32xbf16, #tpu.memory_space<vmem>>, vector<24x32xbf16>,
    } else {
    }
    return
  }
  func.func @transform_0(%arg0: i32, %arg1: i32) -> (i32, i32) {
    %c0_i32 = arith.constant 0 : i32
    %c0_i32_0 = arith.constant 0 : i32
    return %arg0, %c0_i32 : i32, i32
  }
  func.func @transform_1(%arg0: i32, %arg1: i32) -> (i32, i32) {
    %c0_i32 = arith.constant 0 : i32
    %c0_i32_0 = arith.constant 0 : i32
    return %c0_i32, %arg1 : i32, i32
  }
  func.func @transform_2(%arg0: i32, %arg1: i32) -> (i32, i32) {
    %c0_i32 = arith.constant 0 : i32
    %c0_i32_0 = arith.constant 0 : i32
    return %c0_i32, %arg1 : i32, i32
  }
  func.func @transform_3(%arg0: i32, %arg1: i32) -> (i32, i32) {
    %c0_i32 = arith.constant 0 : i32
    %c0_i32_0 = arith.constant 0 : i32
    return %arg1, %c0_i32 : i32, i32
  }
  func.func @transform_4(%arg0: i32, %arg1: i32) -> (i32, i32) {
    %c0_i32 = arith.constant 0 : i32
    %c0_i32_0 = arith.constant 0 : i32
    %c0_i32_1 = arith.constant 0 : i32
    return %c0_i32, %c0_i32_0 : i32, i32
  }
  func.func @transform_5(%arg0: i32, %arg1: i32) -> (i32, i32) {
    %c0_i32 = arith.constant 0 : i32
    %c0_i32_0 = arith.constant 0 : i32
    return %arg0, %c0_i32 : i32, i32
  }
}

</mosaic_0001>

<bundles_post_ra>
// kernel: bert_like_embedder_forward.17
= control target key start
LH: loop header
LB: loop body
LE: loop exit
PB: predicated region body
PF: predicated region fallthrough
CT: control target
= control target key end

     0   :  { %vm32_vm0 = vcmask 261120   ;;  %vm106_vm1 = vcmask 257024   ;;  %s194_s0 = inlined_call_operand.vmem [shape: bf16[24,32], index: 0, kind: input, shape index: {}]   ;;  %s195_s1 = inlined_call_operand.vmem [shape: bf16[24,32], index: 1, kind: input, shape index: {}]   ;;  %s196_s2 = inlined_call_operand.vmem [shape: f32[1,32], index: 2, kind: input, shape index: {}]   ;;  %s197_s3 = inlined_call_operand.vmem [shape: f32[1,32], index: 3, kind: input, shape index: {}]   ;;  %s198_s4 = inlined_call_operand.vmem [shape: bf16[24,32], index: 4, kind: output, shape index: {}]  }
   0x1   :  { %v123_v0 = vld [vmem:[%s194_s0] sm:$0xff]   ;;  %v19_v2 = vld [vmem:[%s194_s0 + $0x8] sm:$0xf] }
   0x2   :  { %v127_v1 = vld [vmem:[%s195_s1] sm:$0xff]   ;;  %v124_v3 = vunpack.c.l.bf16 %v123_v0  ;;  %v22_v5 = vunpack.c.l.bf16 %v19_v2  ;;  %v25_v6 = vld [vmem:[%s195_s1 + $0x8] sm:$0xf]  ;;  %v125_v7 = vunpack.c.h.bf16 %v123_v0 }
   0x3   :  { %v128_v4 = vunpack.c.l.bf16 %v127_v1  ;;  %v28_v8 = vunpack.c.l.bf16 %v25_v6  ;;  %v129_v9 = vunpack.c.h.bf16 %v127_v1  ;;  %v114_v41 = vld [vmem:[%s196_s2] ss:$0 sm:$0xff] }
   0x4   :  { %v115_v43 = vld [vmem:[%s197_s3] ss:$0 sm:$0xff] }
   0x5   :  { %v29_v10 = vadd.f32 %v128_v4, %v124_v3  ;;  %v31_v11 = vadd.f32 %v28_v8, %v22_v5  ;;  %v30_v12 = vadd.f32 %v129_v9, %v125_v7 }
   0x7   :  { %v33_v13 = vsel %vm32_vm0, %v29_v10, 0.0  ;;  %v39_v14 = vsel %vm32_vm0, %v31_v11, 0.0  ;;  %v36_v15 = vsel %vm32_vm0, %v30_v12, 0.0 }
   0x8   :  { %34 = vadd.xlane.f32.xlu0 %v33_v13  ;;  %40 = vadd.xlane.f32.xlu1 %v39_v14 }
   0xc   :  { %37 = vadd.xlane.f32.xlu0 %v36_v15 }
  0x91   :  { %v35_v16 = vpop.xlane.xlu0 %34  ;;  %v41_v18 = vpop.xlane.xlu1 %40 }
  0x92   :  { %v43_v17 = vmul.f32 0.03125, %v35_v16  ;;  %v45_v19 = vmul.f32 0.03125, %v41_v18 }
  0x94   :  { %v46_v20 = vsub.f32 %v29_v10, %v43_v17  ;;  %v48_v21 = vsub.f32 %v31_v11, %v45_v19 }
  0x95   :  { %v38_v22 = vpop.xlane.xlu0 %37 }
  0x96   :  { %v44_v23 = vmul.f32 0.03125, %v38_v22  ;;  %v49_v24 = vmul.f32 %v46_v20, %v46_v20  ;;  %v51_v25 = vmul.f32 %v48_v21, %v48_v21 }
  0x98   :  { %v47_v26 = vsub.f32 %v30_v12, %v44_v23  ;;  %v52_v27 = vsel %vm32_vm0, %v49_v24, 0.0  ;;  %v58_v28 = vsel %vm32_vm0, %v51_v25, 0.0 }
  0x99   :  { %53 = vadd.xlane.f32.xlu1 %v52_v27 }
  0x9a   :  { %v50_v29 = vmul.f32 %v47_v26, %v47_v26 }
  0x9c   :  { %v55_v30 = vsel %vm32_vm0, %v50_v29, 0.0 }
  0x9d   :  { %59 = vadd.xlane.f32.xlu1 %v58_v28  ;;  %56 = vadd.xlane.f32.xlu0 %v55_v30 }
 0x122   :  { %v54_v31 = vpop.xlane.xlu1 %53 }
 0x123   :  { %v61_v32 = vmul.f32 0.03125, %v54_v31 }
 0x125   :  { %v64_v33 = vadd.f32 1e-12, %v61_v32 }
 0x126   :  { %v60_v34 = vpop.xlane.xlu1 %59  ;;  %v57_v35 = vpop.xlane.xlu0 %56 }
 0x127   :  { %130 = vrsqrt.f32 %v64_v33  ;;  %v63_v36 = vmul.f32 0.03125, %v60_v34  ;;  %v62_v37 = vmul.f32 0.03125, %v57_v35 }
 0x129   :  { %v66_v38 = vadd.f32 1e-12, %v63_v36  ;;  %v65_v39 = vadd.f32 1e-12, %v62_v37 }
 0x12b   :  { %132 = vrsqrt.f32 %v66_v38 }
 0x12c   :  { %134 = vrsqrt.f32 %v65_v39 }
 0x134   :  { %v131_v40 = vpop.eup %130 }
 0x135   :  { %v70_v42 = vmul.f32 %v131_v40, %v46_v20 }
 0x137   :  { %v80_v44 = vmul.f32 %v114_v41, %v70_v42 }
 0x138   :  { %v133_v45 = vpop.eup %132 }
 0x139   :  { %v135_v46 = vpop.eup %134  ;;  %v90_v47 = vadd.f32 %v115_v43, %v80_v44  ;;  %v72_v48 = vmul.f32 %v133_v45, %v48_v21 }
 0x13a   :  { %v71_v49 = vmul.f32 %v135_v46, %v47_v26 }
 0x13b   :  { %v119_v50 = vpack.c.bf16 %v90_v47, %v90_v47  ;;  %v82_v51 = vmul.f32 %v114_v41, %v72_v48 }
 0x13c   :  { %v81_v52 = vmul.f32 %v114_v41, %v71_v49 }
 0x13d   :  { %107 = vst.msk [vmem:[%s198_s4] sm:$0xf] %vm106_vm1, %v119_v50  ;;  %v92_v53 = vadd.f32 %v115_v43, %v82_v51 }
 0x13e   :  { %v91_v54 = vadd.f32 %v115_v43, %v81_v52 }
 0x13f   :  { %v121_v55 = vpack.c.bf16 %v92_v53, %v92_v53 }
 0x140   :  { %v120_v56 = vpack.c.bf16 %v91_v54, %v91_v54 }
 0x141   :  { %109 = vst.msk [vmem:[%s198_s4 + $0x8] sm:$0xf] %vm106_vm1, %v121_v55 }
 0x142   :  { %108 = vst.msk [vmem:[%s198_s4 + $0x4] sm:$0xf] %vm106_vm1, %v120_v56 }

// kernel: bert_like_embedder_forward.18
= control target key start
LH: loop header
LB: loop body
LE: loop exit
PB: predicated region body
PF: predicated region fallthrough
CT: control target
= control target key end

     0   :  { %s313_s1 = inlined_call_operand.vmem [shape: bf16[128,128], index: 1, kind: input, shape index: {}]   ;;  %s314_s0 = inlined_call_operand.vmem [shape: bf16[24,128], index: 0, kind: input, shape index: {}]   ;;  %s315_s2 = inlined_call_operand.vmem [shape: f32[1,128], index: 2, kind: input, shape index: {}]   ;;  %s316_s3 = inlined_call_operand.vmem [shape: bf16[24,128], index: 3, kind: output, shape index: {}]  }
   0x1   :  { %v244_v0 = vld [vmem:[%s313_s1 + $0x38] sm:$0xff]   ;;  %v245_v1 = vld [vmem:[%s313_s1 + $0x30] sm:$0xff]   ;;  %v246_v2 = vld [vmem:[%s313_s1 + $0x28] sm:$0xff]  }
   0x2   :  { %224 = vmatprep.subr.bf16.mxu0 %v244_v0  ;;  %v247_v3 = vld [vmem:[%s313_s1 + $0x20] sm:$0xff]   ;;  %v248_v5 = vld [vmem:[%s313_s1 + $0x18] sm:$0xff]   ;;  %v249_v6 = vld [vmem:[%s313_s1 + $0x10] sm:$0xff]  }
   0x3   :  { %225 = vmatpush3.bf16.msra.mxu0 %v244_v0  ;;  %v252_v4 = vld [vmem:[%s314_s0] sm:$0xff]   ;;  %v250_v7 = vld [vmem:[%s313_s1 + $0x8] sm:$0xff]  }
   0x4   :  { %226 = vmatprep.subr.bf16.mxu0 %v245_v1  ;;  %240 = vmatprep.mubr.bf16.mxu0 %v252_v4  ;;  %v251_v8 = vld [vmem:[%s313_s1] sm:$0xff]   ;;  %v253_v9 = vld [vmem:[%s314_s0 + $0x8] ss:$0 sps:$4 sm:$0xff]  }
   0x5   :  { %v202_v10 = vld [vmem:[%s315_s2] ss:$0 sm:$0xff] }
   0x7   :  { %227 = vmatpush3.bf16.msra.mxu0 %v245_v1 }
   0x8   :  { %228 = vmatprep.subr.bf16.mxu0 %v246_v2 }
   0xb   :  { %229 = vmatpush3.bf16.msra.mxu0 %v246_v2 }
   0xc   :  { %230 = vmatprep.subr.bf16.mxu0 %v247_v3 }
   0xf   :  { %231 = vmatpush3.bf16.msra.mxu0 %v247_v3 }
  0x10   :  { %232 = vmatprep.subr.bf16.mxu0 %v248_v5 }
  0x13   :  { %233 = vmatpush3.bf16.msra.mxu0 %v248_v5 }
  0x14   :  { %234 = vmatprep.subr.bf16.mxu0 %v249_v6 }
  0x17   :  { %235 = vmatpush3.bf16.msra.mxu0 %v249_v6 }
  0x18   :  { %236 = vmatprep.subr.bf16.mxu0 %v250_v7 }
  0x1b   :  { %237 = vmatpush3.bf16.msra.mxu0 %v250_v7 }
  0x1c   :  { %238 = vmatprep.subr.bf16.mxu0 %v251_v8 }
  0x1f   :  { %239 = vmatpush3.bf16.msra.mxu0 %v251_v8 }
  0x22   :  { %241 = vmatmul.mubr.bf16.vlgmr.msra.gmra.mxu0 %v253_v9 }
  0xe2   :  { %v242_v11 = vpop.f32.mrf.mxu0 }
  0xe3   :  { %v171_v12 = vadd.f32 %v242_v11, %v202_v10 }
  0xe4   :  { %v136_v13 = vpop.f32.mrf.mxu0 }
  0xe5   :  { %v208_v14 = vpack.c.bf16 %v171_v12, %v171_v12  ;;  %v169_v17 = vadd.f32 %v202_v10, %v136_v13 }
  0xe6   :  { %v243_v15 = vpop.f32.mrf.mxu0 }
  0xe7   :  { %187 = vst [vmem:[%s316_s3 + $0x8] sm:$0xf] %v208_v14 }
  0xe8   :  { %v139_v16 = vpop.f32.mrf.mxu0 }
  0xe9   :  { %v170_v18 = vadd.f32 %v202_v10, %v139_v16 }
  0xeb   :  { %v212_v19 = vpack.c.bf16 %v170_v18, %v169_v17 }
  0xed   :  { %213 = vst [vmem:[%s316_s3] sm:$0xff] %v212_v19  }

// kernel: bert_like_embedder_forward.19
= control target key start
LH: loop header
LB: loop body
LE: loop exit
PB: predicated region body
PF: predicated region fallthrough
CT: control target
= control target key end

     0   :  { %s807_s15 = smov 0   ;;  %s809_s16 = smov 0   ;;  %s878_s0 = inlined_call_operand.vmem [shape: bf16[3,2,4,10,8], index: 0, kind: input, shape index: {}, may-alias: {0,1,2}]   ;;  %s879_s1 = inlined_call_operand.vmem [shape: bf16[3,2,4,10,8], index: 1, kind: input, shape index: {}, may-alias: {0,1,2}]   ;;  %s880_s2 = inlined_call_operand.vmem [shape: bf16[3,2,4,10,8], index: 2, kind: input, shape index: {}, may-alias: {0,1,2}]   ;;  %s881_s3 = inlined_call_operand.vmem [shape: f32[2,1,10], index: 3, kind: input, shape index: {}]   ;;  %s882_s4 = inlined_call_operand.vmem [shape: bf16[2,4,10,8], index: 4, kind: output, shape index: {}]  }
   0x1   :  { %s811_s17 = smov 0   ;;  %s813_s18 = smov 0  }
   0x2   :  { %s815_s19 = smov 0  }
   0x3 LB: > { %s23_s20 = sadd.s32 1, %s770_s17  ;;  %s26_s21 = sadd.s32 1, %s774_s18  ;;  %s778_s19 = sphi %s815_s19, %s14_s19   ;;  %s774_s18 = sphi %s813_s18, %s886_s18   ;;  %s770_s17 = sphi %s811_s17, %s885_s17   ;;  %s766_s16 = sphi %s809_s16, %s884_s16   ;;  %s762_s15 = sphi %s807_s15, %s883_s15  }
   0x4   : > { %p24_p0 = scmp.ge.s32.totalorder %s23_s20, 4  ;;  %p643_p1 = scmp.ge.s32.totalorder %s778_s19, 1 }
   0x5   : > { %p224_p2 = scmp.lt.s32.totalorder %s778_s19, 9 }
   0x6   : > { %s888_s20 = smov (%p24_p0, %s23_s20), 0  ;;  %s890_s21 = smov (!%p24_p0, %s26_s21), %s774_s18 }
   0x7   : > { %p225_p3 = pnand %p643_p1, %p224_p2  ;;  %p28_p4 = scmp.ge.s32.totalorder %s890_s21, 2 }
   0x8   : > { %p281_p5 = scmp.lt.s32.totalorder (!%p225_p3), %s766_s16, 1  ;;  %p283_p6 = scmp.lt.s32.totalorder (!%p225_p3), %s762_s15, 3 }
   0x9   : > { %s892_s21 = smov (%p28_p4, %s890_s21), 0  ;;  %228 = sbr.rel (%p225_p3) target bundleno = 741 (0x2e5), region = 36 }
   0xe   : > { %v780_v0 = vmov 0.0   ;;  %vm781_vm0 = vmmov 0   ;;  %s894_s16 = smov (!%p281_p5, %s766_s16), 1  ;;  %s896_s15 = smov (!%p283_p6, %s762_s15), 3  ;;  %vm349_vm1 = vcmask 64512   ;;  %vm397_vm2 = vcmask 80896  }
   0xf   : > { %676 = vmatprep.subr.bf16.mxu0 %v780_v0  ;;  %678 = vmatprep.mubr.msk.bf16.mxu0 %vm781_vm0, %v780_v0  ;;  %s645_s22 = sshll.u32 %s894_s16, 3  ;;  %s644_s23 = sshll.u32 %s896_s15, 1  ;;  %vm401_vm3 = vcmask 74752   ;;  %vm430_vm4 = vcmask 1044480   ;;  %vm483_vm5 = vcmask 60416   ;;  %vm485_vm6 = vcmask 57344  }
  0x10   : > { %682 = vmatprep.subr.bf16.mxu1 %v780_v0  ;;  %684 = vmatprep.mubr.msk.bf16.mxu1 %vm781_vm0, %v780_v0  ;;  %s287_s24 = sadd.s32 %s645_s22, %s644_s23  ;;  %s312_s8 = scalar_lea.vmem %s881_s3, %s894_s16 }
  0x11   : > { %s837_s25 = sshll.u32 %s287_s24, 2  ;;  %v660_v8 = vld [vmem:[%s312_s8] ss:$0 sm:$0xff] }
  0x12   : > { %s566_s28 = scalar_lea.vmem %s879_s1, %s837_s25  ;;  %s289_s5 = scalar_lea.vmem %s878_s0, %s837_s25 }
  0x13   : > { %v730_v1 = vld [vmem:[%s566_s28 + $0x40] sm:$0x1f]   ;;  %s572_s11 = scalar_lea.vmem %s880_s2, %s837_s25  ;;  %s321_s14 = scalar_lea.vmem %s882_s4, %s837_s25 }
  0x14   : > { %v324_v2 = vld [vmem:[%s289_s5] sm:$0xf]  ;;  %v325_v3 = vld [vmem:[%s289_s5 + $0x4] sm:$0x1]  ;;  %v354_v4 = vsel %vm349_vm1, %v730_v1, 0 }
  0x15   : > { %v326_v5 = vmul.bf16 1052065461, %v324_v2  ;;  %v327_v6 = vmul.bf16 1052065461, %v325_v3  ;;  %677 = vmatpush3.bf16.xpose.msra.mxu0 %v354_v4  ;;  %v731_v27 = vld [vmem:[%s572_s11 + $0x80] sm:$0x1f]  }
  0x16   : > { %v432_v28 = vsel %vm430_vm4, %v731_v27, 0 }
  0x17   : > { %v661_v7 = vcombine.low %v326_v5, %v327_v6  ;;  %683 = vmatpush3.bf16.msra.mxu1 %v432_v28 }
  0x1c   : > { %679 = vmatmul.mubr.msk.bf16.vlgmr.msra.gmra.mxu0 %vm349_vm1, %v661_v7 }
  0xdc   : > { %v390_v9 = vpop.f32.mrf.mxu0 }
  0xdd   : > { %v391_v10 = vadd.f32 %v660_v8, %v390_v9 }
  0xde   : > { %v680_v11 = vpop.f32.mrf.mxu0 }
  0xdf   : > { %v398_v12 = vsel %vm397_vm2, %v391_v10, -inf }
  0xe0   : > { %399 = vmax.xlane.f32.xlu0 %v398_v12  ;;  %v393_v13 = vpop.f32.mrf.mxu0 }
  0xe1   : > { %v394_v14 = vadd.f32 %v660_v8, %v393_v13 }
  0xe2   : > { %v681_v15 = vpop.f32.mrf.mxu0 }
  0xe3   : > { %v402_v16 = vsel %vm401_vm3, %v394_v14, -inf }
  0xe4   : > { %403 = vmax.xlane.f32.xlu0 %v402_v16 }
 0x169   : > { %v400_v17 = vpop.xlane.xlu0 %399 }
 0x16a   : > { %v405_v18 = vsub.f32 %v391_v10, %v400_v17 }
 0x16c   : > { %v407_v19 = vmul.f32 1.442695, %v405_v18 }
 0x16d   : > { %v404_v20 = vpop.xlane.xlu0 %403 }
 0x16e   : > { %732 = vpow2.f32 %v407_v19  ;;  %v406_v21 = vsub.f32 %v394_v14, %v404_v20 }
 0x170   : > { %v409_v22 = vmul.f32 1.442695, %v406_v21 }
 0x172   : > { %734 = vpow2.f32 %v409_v22 }
 0x17b   : > { %v733_v23 = vpop.eup %732 }
 0x17c   : > { %v411_v24 = vsel %vm397_vm2, %v733_v23, 0.0 }
 0x17d   : > { %412 = vadd.xlane.f32.xlu1 %v411_v24 }
 0x17f   : > { %v735_v25 = vpop.eup %734 }
 0x180   : > { %v414_v26 = vsel %vm401_vm3, %v735_v25, 0.0 }
 0x181   : > { %415 = vadd.xlane.f32.xlu1 %v414_v26 }
 0x206   : > { %v413_v29 = vpop.xlane.xlu1 %412 }
 0x207   : > { %736 = vrcp.f32 %v413_v29 }
 0x20a   : > { %v416_v30 = vpop.xlane.xlu1 %415 }
 0x20b   : > { %738 = vrcp.f32 %v416_v30 }
 0x214   : > { %v737_v31 = vpop.eup %736 }
 0x215   : > { %v419_v33 = vmul.f32 %v737_v31, %v733_v23 }
 0x218   : > { %v739_v32 = vpop.eup %738 }
 0x219   : > { %v420_v34 = vmul.f32 %v739_v32, %v735_v25 }
 0x21b   : > { %v421_v35 = vpack.c.bf16 %v420_v34, %v419_v33 }
 0x21d   : > { %685 = vmatmul.mubr.msk.bf16.vlgmr.msra.gmra.mxu1 %vm397_vm2, %v421_v35 }
 0x2dd   : > { %v468_v36 = vpop.f32.mrf.mxu1 }
 0x2de   : > { %v670_v37 = vpack.c.bf16 %v468_v36, %v468_v36 }
 0x2df   : > { %v686_v38 = vpop.f32.mrf.mxu1 }
 0x2e0   : > { %484 = vst.msk [vmem:[%s321_s14] sm:$0xf] %vm483_vm5, %v670_v37 }
 0x2e1   : > { %v471_v39 = vpop.f32.mrf.mxu1 }
 0x2e2   : > { %v671_v40 = vpack.c.bf16 %v471_v39, %v471_v39 }
 0x2e3   : > { %v687_v41 = vpop.f32.mrf.mxu1 }
 0x2e4   : > { %486 = vst.msk [vmem:[%s321_s14 + $0x4] sm:$0x1] %vm485_vm6, %v671_v40 }
 0x2e5 PF: > { %s14_s19 = sadd.s32 1, %s778_s19   ;;  %s883_s15 = smov %s770_s17 }
 0x2e6   : > { %p11_p7 = scmp.ge.s32.totalorder %s14_s19, 10   ;;  %s884_s16 = smov %s774_s18 }
 0x2e7   : > { %s885_s17 = smov %s888_s20  ;;  %s886_s18 = smov %s892_s21 }
 0x2e8   :  { %13 = sbr.rel (!%p11_p7) target bundleno = 3 (0x3), region = 75 }

// kernel: bert_like_embedder_forward.30
= control target key start
LH: loop header
LB: loop body
LE: loop exit
PB: predicated region body
PF: predicated region fallthrough
CT: control target
= control target key end

     0   :  { %s219_s6 = smov 0   ;;  %s236_s0 = inlined_call_operand.vmem [shape: s32[2,1,10], index: 0, kind: input, shape index: {}]   ;;  %s237_s1 = inlined_call_operand.vmem [shape: bf16[2,8,10], index: 1, kind: output, shape index: {}]  }
   0x1 LB: > { %s179_s7 = sadd.s32 4294967295, %s206_s6   ;;  %p183_p0 = scmp.ge.s32.totalorder %s206_s6, 1  ;;  %s206_s6 = sphi %s219_s6, %s11_s6  }
   0x2   : > { %p85_p1 = scmp.lt.s32.totalorder %s206_s6, 3 }
   0x4   : > { %p86_p2 = pnand %p183_p0, %p85_p1 }
   0x5   : > { %p102_p3 = scmp.lt.s32.totalorder (!%p86_p2), %s179_s7, 1 }
   0x6   : > { %89 = sbr.rel (%p86_p2) target bundleno = 177 (0xb1), region = 24 }
   0xb   : > { %v110_v0 = vlaneseq  ;;  %s239_s7 = smov (!%p102_p3, %s179_s7), 1  ;;  %vm119_vm0 = vcmask 80896   ;;  %v208_v3 = vmov 0.0   ;;  %vm127_vm2 = vcmask 76800  }
   0xc   : > { %s104_s10 = scalar_lea.vmem %s236_s0, %s239_s7  ;;  %s184_s11 = sshll.u32 %s239_s7, 2 }
   0xd   : > { %v111_v1 = vshrl.u32 %v110_v0, 7  ;;  %v185_v2 = vld [vmem:[%s104_s10] ss:$0 sm:$0xff]  ;;  %s108_s14 = scalar_lea.vmem %s237_s1, %s184_s11 }
   0xf   : > { %vm116_vm1 = vcmp.eq.s32.totalorder %v111_v1, %v185_v2 }
  0x10   : > { %v186_v4 = vsel %vm116_vm1, 1.0, %v208_v3 }
  0x11   : > { %v120_v5 = vsel %vm119_vm0, %v186_v4, 0.0 }
  0x12   : > { %121 = vadd.xlane.f32.xlu0 %v120_v5 }
  0x9b   : > { %v122_v6 = vpop.xlane.xlu0 %121 }
  0x9c   : > { %v123_v7 = vmax.f32 %v122_v6, 1e-12 }
  0x9e   : > { %198 = vrcp.f32 %v123_v7 }
  0xab   : > { %v199_v8 = vpop.eup %198 }
  0xac   : > { %v125_v9 = vmul.f32 %v199_v8, %v186_v4 }
  0xae   : > { %v126_v10 = vpack.c.bf16 %v125_v9, %v125_v9 }
  0xb0   : > { %128 = vst.msk [vmem:[%s108_s14] sm:$0xf] %vm127_vm2, %v126_v10 }
  0xb1 PF: > { %s11_s6 = sadd.s32 1, %s206_s6  }
  0xb2   : > { %p8_p4 = scmp.ge.s32.totalorder %s11_s6, 4  }
  0xb4   :  { %10 = sbr.rel (!%p8_p4) target bundleno = 1 (0x1), region = 54 }

// kernel: bert_like_embedder_forward.33
= control target key start
LH: loop header
LB: loop body
LE: loop exit
PB: predicated region body
PF: predicated region fallthrough
CT: control target
= control target key end

     0   :  { %s341_s9 = smov 0   ;;  %s361_s0 = inlined_call_operand.vmem [shape: bf16[2,8,10], index: 0, kind: input, shape index: {}]   ;;  %s362_s1 = inlined_call_operand.vmem [shape: bf16[2,10,32], index: 1, kind: input, shape index: {}]   ;;  %s363_s2 = inlined_call_operand.vmem [shape: f32[2,8,32], index: 2, kind: output, shape index: {}]  }
   0x1 LB: > { %s283_s10 = sadd.s32 4294967295, %s322_s9   ;;  %p287_p0 = scmp.ge.s32.totalorder %s322_s9, 1  ;;  %s322_s9 = sphi %s341_s9, %s12_s9  }
   0x2   : > { %p121_p1 = scmp.lt.s32.totalorder %s322_s9, 3 }
   0x4   : > { %p122_p2 = pnand %p287_p0, %p121_p1 }
   0x5   : > { %p146_p3 = scmp.lt.s32.totalorder (!%p122_p2), %s283_s10, 1 }
   0x6   : > { %125 = sbr.rel (%p122_p2) target bundleno = 218 (0xda), region = 28 }
   0xb   : > { %v324_v0 = vmov 0.0   ;;  %vm325_vm0 = vmmov 0   ;;  %s365_s10 = smov (!%p146_p3, %s283_s10), 1  ;;  %vm172_vm1 = vcmask 1044480   ;;  %vm168_vm2 = vcmask 80896  }
   0xc   : > { %299 = vmatprep.subr.bf16.mxu0 %v324_v0  ;;  %301 = vmatprep.mubr.msk.bf16.mxu0 %vm325_vm0, %v324_v0  ;;  %s296_s11 = sshll.u32 %s365_s10, 3  ;;  %s288_s12 = sshll.u32 %s365_s10, 2  ;;  %vm216_vm3 = vcmask 261120  }
   0xd   : > { %s154_s15 = scalar_lea.vmem %s362_s1, %s296_s11  ;;  %s149_s18 = scalar_lea.vmem %s361_s0, %s288_s12 }
   0xe   : > { %v315_v1 = vld [vmem:[%s154_s15] sm:$0x1f]   ;;  %s158_s21 = scalar_lea.vmem %s363_s2, %s296_s11 }
   0xf   : > { %v174_v2 = vsel %vm172_vm1, %v315_v1, 0  ;;  %v160_v3 = vld [vmem:[%s149_s18] sm:$0xf] }
  0x10   : > { %300 = vmatpush3.bf16.msra.mxu0 %v174_v2 }
  0x13   : > { %302 = vmatmul.mubr.msk.bf16.vlgmr.msra.gmra.mxu0 %vm168_vm2, %v160_v3 }
  0xd3   : > { %v210_v4 = vpop.f32.mrf.mxu0 }
  0xd4   : > { %217 = vst.msk [vmem:[%s158_s21] sm:$0xff] %vm216_vm3, %v210_v4 }
  0xd5   : > { %v303_v5 = vpop.f32.mrf.mxu0 }
  0xd7   : > { %v213_v6 = vpop.f32.mrf.mxu0 }
  0xd9   : > { %v304_v7 = vpop.f32.mrf.mxu0 }
  0xda PF: > { %s12_s9 = sadd.s32 1, %s322_s9  }
  0xdb   : > { %p9_p4 = scmp.ge.s32.totalorder %s12_s9, 4  }
  0xdd   :  { %11 = sbr.rel (!%p9_p4) target bundleno = 1 (0x1), region = 61 }

// kernel: bert_like_embedder_forward.22
= control target key start
LH: loop header
LB: loop body
LE: loop exit
PB: predicated region body
PF: predicated region fallthrough
CT: control target
= control target key end

     0   :  { %vm25_vm0 = vcmask 261120   ;;  %v388_v12 = vmov 0.0   ;;  %vm297_vm1 = vcmask 257024   ;;  %s478_s1 = inlined_call_operand.vmem [shape: bf16[32,128], index: 1, kind: input, shape index: {}]   ;;  %s479_s0 = inlined_call_operand.vmem [shape: bf16[24,32], index: 0, kind: input, shape index: {}]   ;;  %s480_s3 = inlined_call_operand.vmem [shape: bf16[128,32], index: 3, kind: input, shape index: {}]   ;;  %s481_s2 = inlined_call_operand.vmem [shape: f32[1,128], index: 2, kind: input, shape index: {}]   ;;  %s482_s4 = inlined_call_operand.vmem [shape: f32[1,32], index: 4, kind: input, shape index: {}]   ;;  %s483_s5 = inlined_call_operand.vmem [shape: bf16[24,32], index: 5, kind: output, shape index: {}]  }
   0x1   :  { %v370_v0 = vld [vmem:[%s478_s1 + $0x8] sm:$0xff]   ;;  %v371_v1 = vld [vmem:[%s478_s1] sm:$0xff]   ;;  %v374_v4 = vld [vmem:[%s480_s3 + $0x38] sm:$0xff]   ;;  %28 = vst.msk [vmem:[#allocation2 + $0x10] sm:$0xff] %vm25_vm0, %v388_v12 }
   0x2   :  { %341 = vmatprep.subr.bf16.mxu0 %v370_v0  ;;  %v372_v2 = vld [vmem:[%s479_s0] sm:$0xff]   ;;  %v373_v3 = vld [vmem:[%s479_s0 + $0x8] ss:$0 sps:$4 sm:$0xff]   ;;  %349 = vmatprep.subr.bf16.mxu1 %v374_v4  ;;  %v375_v5 = vld [vmem:[%s480_s3 + $0x30] sm:$0xff]   ;;  %26 = vst.msk [vmem:[#allocation2] sm:$0xff] %vm25_vm0, %v388_v12 }
   0x3   :  { %342 = vmatpush3.bf16.msra.mxu0 %v370_v0  ;;  %345 = vmatprep.mubr.msk.bf16.mxu0 %vm25_vm0, %v372_v2  ;;  %v376_v6 = vld [vmem:[%s480_s3 + $0x28] sm:$0xff]   ;;  %v377_v7 = vld [vmem:[%s480_s3 + $0x20] sm:$0xff]   ;;  %v378_v8 = vld [vmem:[%s480_s3 + $0x18] sm:$0xff]   ;;  %27 = vst.msk [vmem:[#allocation2 + $0x8] sm:$0xff] %vm25_vm0, %v388_v12 }
   0x4   :  { %343 = vmatprep.subr.bf16.mxu0 %v371_v1  ;;  %350 = vmatpush3.bf16.msra.mxu1 %v374_v4  ;;  %v379_v9 = vld [vmem:[%s480_s3 + $0x10] sm:$0xff]   ;;  %v380_v10 = vld [vmem:[%s480_s3 + $0x8] sm:$0xff]   ;;  %v381_v11 = vld [vmem:[%s480_s3] sm:$0xff]  }
   0x5   :  { %351 = vmatprep.subr.bf16.mxu1 %v375_v5  ;;  %v305_v13 = vld [vmem:[%s481_s2] ss:$0 sm:$0xff] }
   0x6   :  { %v320_v60 = vld [vmem:[%s482_s4] ss:$0 sm:$0xff] }
   0x7   :  { %344 = vmatpush3.bf16.msra.mxu0 %v371_v1 }
   0x8   :  { %352 = vmatpush3.bf16.msra.mxu1 %v375_v5  ;;  %v147_v50 = vld [vmem:[#allocation2 + $0x10] sm:$0xff] }
   0x9   :  { %353 = vmatprep.subr.bf16.mxu1 %v376_v6  ;;  %v145_v52 = vld [vmem:[#allocation2] sm:$0xff] }
   0xa   :  { %346 = vmatmul.mubr.msk.bf16.vlgmr.msra.gmra.mxu0 %vm25_vm0, %v373_v3  ;;  %v146_v57 = vld [vmem:[#allocation2 + $0x8] sm:$0xff] }
   0xc   :  { %354 = vmatpush3.bf16.msra.mxu1 %v376_v6 }
   0xd   :  { %355 = vmatprep.subr.bf16.mxu1 %v377_v7 }
  0x10   :  { %356 = vmatpush3.bf16.msra.mxu1 %v377_v7 }
  0x11   :  { %357 = vmatprep.subr.bf16.mxu1 %v378_v8 }
  0x14   :  { %358 = vmatpush3.bf16.msra.mxu1 %v378_v8 }
  0x15   :  { %359 = vmatprep.subr.bf16.mxu1 %v379_v9 }
  0x18   :  { %360 = vmatpush3.bf16.msra.mxu1 %v379_v9 }
  0x19   :  { %361 = vmatprep.subr.bf16.mxu1 %v380_v10 }
  0x1c   :  { %362 = vmatpush3.bf16.msra.mxu1 %v380_v10 }
  0x1d   :  { %363 = vmatprep.subr.bf16.mxu1 %v381_v11 }
  0x20   :  { %364 = vmatpush3.bf16.msra.mxu1 %v381_v11 }
  0xca   :  { %v347_v14 = vpop.f32.mrf.mxu0 }
  0xcb   :  { %v113_v15 = vadd.f32 %v347_v14, %v305_v13 }
  0xcc   :  { %v104_v16 = vpop.f32.mrf.mxu0 }
  0xcd   :  { %v120_v17 = vmul.f32 %v113_v15, %v113_v15  ;;  %v105_v18 = vadd.f32 %v305_v13, %v104_v16 }
  0xce   :  { %v348_v19 = vpop.f32.mrf.mxu0 }
  0xcf   :  { %v123_v20 = vmul.f32 %v120_v17, %v113_v15  ;;  %v118_v21 = vmul.f32 %v105_v18, %v105_v18 }
  0xd0   :  { %v107_v22 = vpop.f32.mrf.mxu0 }
  0xd1   :  { %v126_v23 = vmul.f32 0.044715, %v123_v20  ;;  %v121_v24 = vmul.f32 %v118_v21, %v105_v18  ;;  %v108_v25 = vadd.f32 %v305_v13, %v107_v22 }
  0xd3   :  { %v129_v26 = vadd.f32 %v126_v23, %v113_v15  ;;  %v124_v27 = vmul.f32 0.044715, %v121_v24  ;;  %v119_v28 = vmul.f32 %v108_v25, %v108_v25 }
  0xd5   :  { %v132_v29 = vmul.f32 0.7978846, %v129_v26  ;;  %v127_v30 = vadd.f32 %v124_v27, %v105_v18  ;;  %v122_v31 = vmul.f32 %v119_v28, %v108_v25 }
  0xd7   :  { %382 = vtanh.f32 %v132_v29  ;;  %v125_v32 = vmul.f32 0.044715, %v122_v31  ;;  %v130_v33 = vmul.f32 0.7978846, %v127_v30 }
  0xd9   :  { %v128_v34 = vadd.f32 %v125_v32, %v108_v25  ;;  %384 = vtanh.f32 %v130_v33 }
  0xdb   :  { %v131_v35 = vmul.f32 0.7978846, %v128_v34 }
  0xdd   :  { %386 = vtanh.f32 %v131_v35 }
  0xe4   :  { %v383_v36 = vpop.eup %382 }
  0xe5   :  { %v138_v38 = vadd.f32 1.0, %v383_v36 }
  0xe6   :  { %v385_v37 = vpop.eup %384 }
  0xe7   :  { %v136_v39 = vadd.f32 1.0, %v385_v37  ;;  %v141_v41 = vmul.f32 0.5, %v138_v38 }
  0xe9   :  { %v139_v43 = vmul.f32 0.5, %v136_v39  ;;  %v144_v45 = vmul.f32 %v141_v41, %v113_v15 }
  0xea   :  { %v387_v40 = vpop.eup %386 }
  0xeb   :  { %v137_v42 = vadd.f32 1.0, %v387_v40  ;;  %v142_v46 = vmul.f32 %v139_v43, %v105_v18  ;;  %v149_v49 = vpack.c.bf16 %v144_v45, %v144_v45 }
  0xed   :  { %v140_v44 = vmul.f32 0.5, %v137_v42 }
  0xef   :  { %v143_v47 = vmul.f32 %v140_v44, %v108_v25 }
  0xf1   :  { %v148_v48 = vpack.c.bf16 %v143_v47, %v142_v46 }
  0xf3   :  { %365 = vmatprep.mubr.bf16.mxu1 %v148_v48 }
  0xf4   :  { %366 = vmatmul.mubr.bf16.vlgmr.msra.gmra.mxu1 %v149_v49 }
 0x1b4   :  { %v367_v51 = vpop.f32.mrf.mxu1 }
 0x1b5   :  { %v264_v53 = vadd.f32 %v367_v51, %v147_v50 }
 0x1b6   :  { %v248_v54 = vpop.f32.mrf.mxu1 }
 0x1b7   :  { %267 = vst.msk [vmem:[#allocation2 + $0x10] sm:$0xff] %vm25_vm0, %v264_v53  ;;  %v262_v55 = vadd.f32 %v248_v54, %v145_v52 }
 0x1b8   :  { %v368_v56 = vpop.f32.mrf.mxu1 }
 0x1b9   :  { %265 = vst.msk [vmem:[#allocation2] sm:$0xff] %vm25_vm0, %v262_v55 }
 0x1ba   :  { %v251_v58 = vpop.f32.mrf.mxu1 }
 0x1bb   :  { %v263_v59 = vadd.f32 %v251_v58, %v146_v57 }
 0x1bd   :  { %266 = vst.msk [vmem:[#allocation2 + $0x8] sm:$0xff] %vm25_vm0, %v263_v59 }
 0x1be   :  { %v273_v61 = vld [vmem:[#allocation2 + $0x10] sm:$0xff] }
 0x1bf   :  { %v283_v62 = vadd.f32 %v320_v60, %v273_v61 }
 0x1c0   :  { %v271_v63 = vld [vmem:[#allocation2] sm:$0xff] }
 0x1c1   :  { %v326_v0 = vpack.c.bf16 %v283_v62, %v283_v62  ;;  %v281_v1 = vadd.f32 %v320_v60, %v271_v63 }
 0x1c3   :  { %300 = vst.msk [vmem:[%s483_s5 + $0x8] sm:$0xf] %vm297_vm1, %v326_v0  ;;  %v324_v2 = vpack.c.bf16 %v281_v1, %v281_v1 }
 0x1c4   :  { %v272_v3 = vld [vmem:[#allocation2 + $0x8] sm:$0xff] }
 0x1c5   :  { %298 = vst.msk [vmem:[%s483_s5] sm:$0xf] %vm297_vm1, %v324_v2  ;;  %v282_v4 = vadd.f32 %v320_v60, %v272_v3 }
 0x1c7   :  { %v325_v5 = vpack.c.bf16 %v282_v4, %v282_v4 }
 0x1c9   :  { %299 = vst.msk [vmem:[%s483_s5 + $0x4] sm:$0xf] %vm297_vm1, %v325_v5 }

</bundles_post_ra>
